<compile_context>
chip_gen: v7x
topology: tpu7x:2x2x1
jax: 0.10.0
libtpu: 0.0.40
codegen_flags: <defaults>
</compile_context>

<pallas_src>
import jax
import jax.numpy as jnp
from jax.experimental import pallas as pl
from jax.experimental.pallas import tpu as pltpu


# --------------------------------------------------------------------------
# Shared per-step math (reads weight slabs straight from VMEM refs).
# --------------------------------------------------------------------------
def _argsnet_step(x, h, gru_w_ref, gru_b_ref, fc_w_ref, fc_b_ref):
    """One ArgsNet step. x: (B, I) f32, h: (B, H) f32 -> (out (B, I), new_h (B, H))."""
    I = x.shape[-1]
    H = h.shape[-1]
    F1P = fc_b_ref.shape[-1]          # padded fc1 width (e.g. 64)

    def gate_pre(g):
        # Sublane-aligned sub-blocks of the per-gate slab: no lane-offset slicing.
        wi = gru_w_ref[g, 0:I, :]          # (I, H)
        wh = gru_w_ref[g, I:I + H, :]      # (H, H)
        return (jnp.dot(x, wi, preferred_element_type=jnp.float32)
                + jnp.dot(h, wh, preferred_element_type=jnp.float32))

    # r / z gates use pre-combined biases (b_ih + b_hh).
    r = jax.nn.sigmoid(gate_pre(0) + gru_b_ref[0])
    z = jax.nn.sigmoid(gate_pre(1) + gru_b_ref[1])

    # n gate keeps the input/hidden contributions separate (PyTorch semantics:
    # n = tanh(i_n + b_in + r * (h_n + b_hn))).
    i_n = jnp.dot(x, gru_w_ref[2, 0:I, :],
                  preferred_element_type=jnp.float32) + gru_b_ref[2]
    h_n = jnp.dot(h, gru_w_ref[2, I:I + H, :],
                  preferred_element_type=jnp.float32) + gru_b_ref[3]
    n = jnp.tanh(i_n + r * h_n)
    new_h = (1.0 - z) * n + z * h                                   # (B, H)

    # fc1 (padded to F1P) + ReLU, then fc2 (output padded to F1P lanes, sliced).
    w1 = fc_w_ref[0:H, :]              # (H, F1P)
    w2 = fc_w_ref[H:H + F1P, :]        # (F1P, F1P)  (cols >= I and rows >= 50 are zero)
    a1 = jnp.dot(new_h, w1, preferred_element_type=jnp.float32) + fc_b_ref[0]
    a1 = jnp.maximum(a1, 0.0)
    out_full = jnp.dot(a1, w2, preferred_element_type=jnp.float32) + fc_b_ref[1]
    return out_full[:, :I], new_h


# --------------------------------------------------------------------------
# Single-step kernel (matches ArgsNet.forward exactly).
# --------------------------------------------------------------------------
def argsnet_kernel(x_ref, h_ref, gru_w_ref, gru_b_ref, fc_w_ref, fc_b_ref,
                   out_ref, newh_ref):
    x = x_ref[...].astype(jnp.float32)     # explicit f32 cast point after load
    h = h_ref[...].astype(jnp.float32)
    out, new_h = _argsnet_step(x, h, gru_w_ref, gru_b_ref, fc_w_ref, fc_b_ref)
    out_ref[...] = out.astype(out_ref.dtype)
    newh_ref[...] = new_h.astype(newh_ref.dtype)


# --------------------------------------------------------------------------
# Fused multi-step (recurrent) kernel: T steps inside one pallas_call.
# Weights stay VMEM-resident (constant block index); hidden state is carried
# in the resident hT output block across the sequential grid axis.
# --------------------------------------------------------------------------
def argsnet_seq_kernel(xs_ref, h0_ref, gru_w_ref, gru_b_ref, fc_w_ref, fc_b_ref,
                       out_ref, hT_ref):
    @pl.when(pl.program_id(0) == 0)
    def _init():
        hT_ref[...] = h0_ref[...]

    x = xs_ref[...].astype(jnp.float32)    # (B, I) — leading time dim squeezed
    h = hT_ref[...].astype(jnp.float32)    # (B, H) carried hidden state
    out, new_h = _argsnet_step(x, h, gru_w_ref, gru_b_ref, fc_w_ref, fc_b_ref)
    out_ref[...] = out.astype(out_ref.dtype)
    hT_ref[...] = new_h.astype(hT_ref.dtype)


# --------------------------------------------------------------------------
# Parameters (PyTorch layout) + packing into the kernel slabs.
# --------------------------------------------------------------------------
def make_argsnet_params(key, input_size, hidden_size, fc1_size=50, dtype=jnp.float32):
    """Deterministic params mirroring torch.nn.GRUCell / nn.Linear shapes."""
    ks = jax.random.split(key, 8)
    s = 0.1
    I, H, F1 = input_size, hidden_size, fc1_size
    return {
        "weight_ih": (s * jax.random.normal(ks[0], (3 * H, I))).astype(dtype),
        "weight_hh": (s * jax.random.normal(ks[1], (3 * H, H))).astype(dtype),
        "bias_ih":   (s * jax.random.normal(ks[2], (3 * H,))).astype(dtype),
        "bias_hh":   (s * jax.random.normal(ks[3], (3 * H,))).astype(dtype),
        "fc1_w":     (s * jax.random.normal(ks[4], (F1, H))).astype(dtype),
        "fc1_b":     (s * jax.random.normal(ks[5], (F1,))).astype(dtype),
        "fc2_w":     (s * jax.random.normal(ks[6], (I, F1))).astype(dtype),
        "fc2_b":     (s * jax.random.normal(ks[7], (I,))).astype(dtype),
    }


def pack_argsnet_params(p, input_size, hidden_size, fc1_pad=64, dtype=jnp.float32):
    """Pack torch-layout params into 4 DMA-friendly slabs.

    dtype may be jnp.bfloat16 on v6e/v7x to halve weight DMA bytes (gate math
    stays f32 in-kernel); the demo keeps f32 so the 1e-5 tolerance holds.
    """
    I, H = input_size, hidden_size
    F1 = p["fc1_b"].shape[-1]
    F1P = fc1_pad
    assert F1P >= max(F1, I) and F1P % 8 == 0

    w_ih_t = p["weight_ih"].T.astype(jnp.float32)    # (I, 3H)
    w_hh_t = p["weight_hh"].T.astype(jnp.float32)    # (H, 3H)
    # (3, I+H, H): per gate, [w_ih_g ; w_hh_g] stacked on the sublane axis.
    gru_w = jnp.stack(
        [jnp.concatenate([w_ih_t[:, g * H:(g + 1) * H],
                          w_hh_t[:, g * H:(g + 1) * H]], axis=0)
         for g in range(3)], axis=0).astype(dtype)

    b_ih = p["bias_ih"].astype(jnp.float32)
    b_hh = p["bias_hh"].astype(jnp.float32)
    gru_b = jnp.stack([
        b_ih[0:H] + b_hh[0:H],            # combined reset-gate bias
        b_ih[H:2 * H] + b_hh[H:2 * H],    # combined update-gate bias
        b_ih[2 * H:3 * H],                # b_in
        b_hh[2 * H:3 * H],                # b_hn
    ], axis=0).reshape(4, 1, H).astype(dtype)

    w1p = jnp.zeros((H, F1P), jnp.float32).at[:, :F1].set(p["fc1_w"].T.astype(jnp.float32))
    w2p = jnp.zeros((F1P, F1P), jnp.float32).at[:F1, :I].set(p["fc2_w"].T.astype(jnp.float32))
    fc_w = jnp.concatenate([w1p, w2p], axis=0).astype(dtype)         # (H+F1P, F1P)

    fc_b = jnp.zeros((2, 1, F1P), jnp.float32)
    fc_b = fc_b.at[0, 0, :F1].set(p["fc1_b"].astype(jnp.float32))
    fc_b = fc_b.at[1, 0, :I].set(p["fc2_b"].astype(jnp.float32))
    fc_b = fc_b.astype(dtype)

    return {"gru_w": gru_w, "gru_b": gru_b, "fc_w": fc_w, "fc_b": fc_b}


# --------------------------------------------------------------------------
# Wrappers.
# --------------------------------------------------------------------------
def _full_block(a):
    nd = a.ndim
    return pl.BlockSpec(a.shape, lambda *_, nd=nd: (0,) * nd)


def argsnet_forward(x, h, packed):
    """Single ArgsNet step: x (B, I), h (B, H) -> (out (B, I), new_h (B, H))."""
    B, I = x.shape
    _, H = h.shape
    args = (x, h, packed["gru_w"], packed["gru_b"], packed["fc_w"], packed["fc_b"])

    out, new_h = pl.pallas_call(
        argsnet_kernel,
        out_shape=(jax.ShapeDtypeStruct((B, I), x.dtype),
                   jax.ShapeDtypeStruct((B, H), h.dtype)),
        grid=(),
        in_specs=[_full_block(a) for a in args],
        out_specs=(pl.BlockSpec((B, I), lambda *_: (0, 0)),
                   pl.BlockSpec((B, H), lambda *_: (0, 0))),
        input_output_aliases={1: 1},   # h buffer aliases new_h
    )(*args)
    return out, new_h


def argsnet_forward_seq(xs, h0, packed):
    """Fused recurrent ArgsNet over T steps inside one kernel.

    xs: (T, B, I), h0: (B, H) -> (out_seq (T, B, I), h_T (B, H)).
    Weights stay VMEM-resident across all T steps (constant block indices).
    """
    T, B, I = xs.shape
    _, H = h0.shape
    gru_w, gru_b, fc_w, fc_b = (packed["gru_w"], packed["gru_b"],
                                packed["fc_w"], packed["fc_b"])

    in_specs = [
        pl.BlockSpec((None, B, I), lambda t: (t, 0, 0)),        # x_t, streamed
        pl.BlockSpec((B, H), lambda t: (0, 0)),                 # h0, resident
        pl.BlockSpec(gru_w.shape, lambda t: (0, 0, 0)),         # weights resident
        pl.BlockSpec(gru_b.shape, lambda t: (0, 0, 0)),
        pl.BlockSpec(fc_w.shape, lambda t: (0, 0)),
        pl.BlockSpec(fc_b.shape, lambda t: (0, 0, 0)),
    ]
    out_specs = (
        pl.BlockSpec((None, B, I), lambda t: (t, 0, 0)),        # out_t, streamed
        pl.BlockSpec((B, H), lambda t: (0, 0)),                 # hidden carry / h_T
    )

    out_seq, h_T = pl.pallas_call(
        argsnet_seq_kernel,
        out_shape=(jax.ShapeDtypeStruct((T, B, I), xs.dtype),
                   jax.ShapeDtypeStruct((B, H), h0.dtype)),
        grid=(T,),
        in_specs=in_specs,
        out_specs=out_specs,
        input_output_aliases={1: 1},   # h0 buffer aliases h_T
        compiler_params=pltpu.CompilerParams(
            dimension_semantics=("arbitrary",)),   # sequential carry over T
    )(xs, h0, gru_w, gru_b, fc_w, fc_b)
    return out_seq, h_T


# --------------------------------------------------------------------------
# Pure-JAX reference (mirrors torch.nn.GRUCell + Linear exactly).
# --------------------------------------------------------------------------
def argsnet_reference(x, h, p):
    H = h.shape[-1]
    gi = x @ p["weight_ih"].T + p["bias_ih"]
    gh = h @ p["weight_hh"].T + p["bias_hh"]
    i_r, i_z, i_n = gi[:, :H], gi[:, H:2 * H], gi[:, 2 * H:]
    h_r, h_z, h_n = gh[:, :H], gh[:, H:2 * H], gh[:, 2 * H:]
    r = jax.nn.sigmoid(i_r + h_r)
    z = jax.nn.sigmoid(i_z + h_z)
    n = jnp.tanh(i_n + r * h_n)
    new_h = (1.0 - z) * n + z * h
    a1 = jnp.maximum(new_h @ p["fc1_w"].T + p["fc1_b"], 0.0)
    out = a1 @ p["fc2_w"].T + p["fc2_b"]
    return out, new_h


if __name__ == "__main__":
    key = jax.random.PRNGKey(0)
    k_x, k_h, k_p, k_seq = jax.random.split(key, 4)

    batch = 8
    input_size = 16
    hidden_size = 32
    seq_len = 12

    params = make_argsnet_params(k_p, input_size, hidden_size)
    packed = pack_argsnet_params(params, input_size, hidden_size)

    x = jax.random.normal(k_x, (batch, input_size), dtype=jnp.float32)
    h = jax.random.normal(k_h, (batch, hidden_size), dtype=jnp.float32)

    # --- single step (module semantics) ---
    ref_out, ref_new_h = argsnet_reference(x, h, params)
    ref_out = jax.block_until_ready(ref_out)
    ref_new_h = jax.block_until_ready(ref_new_h)

    out, new_h = argsnet_forward(x, h, packed)
    out = jax.block_until_ready(out)
    new_h = jax.block_until_ready(new_h)

    assert out.shape == (batch, input_size)
    assert new_h.shape == (batch, hidden_size)
    assert jnp.allclose(out, ref_out, atol=1e-5, rtol=1e-5)
    assert jnp.allclose(new_h, ref_new_h, atol=1e-5, rtol=1e-5)

    # --- fused T-step recurrent variant (amortized launch/DMA) ---
    xs = jax.random.normal(k_seq, (seq_len, batch, input_size), dtype=jnp.float32)

    ref_hT = h
    ref_outs = []
    for t in range(seq_len):
        o_t, ref_hT = argsnet_reference(xs[t], ref_hT, params)
        ref_outs.append(o_t)
    ref_outs = jax.block_until_ready(jnp.stack(ref_outs, axis=0))
    ref_hT = jax.block_until_ready(ref_hT)

    out_seq, hT = argsnet_forward_seq(xs, h, packed)
    out_seq = jax.block_until_ready(out_seq)
    hT = jax.block_until_ready(hT)

    assert out_seq.shape == (seq_len, batch, input_size)
    assert hT.shape == (batch, hidden_size)
    assert jnp.allclose(out_seq, ref_outs, atol=1e-4, rtol=1e-4)
    assert jnp.allclose(hT, ref_hT, atol=1e-4, rtol=1e-4)

    print("KERNEL_OK")
</pallas_src>

<mosaic_0001>
module attributes {stable_mosaic.version = 11 : i64} {
  func.func @argsnet_kernel(%arg0: memref<8x16xf32, #tpu.memory_space<vmem>>, %arg1: memref<8x32xf32, #tpu.memory_space<vmem>>, %arg2: memref<3x48x32xf32, #tpu.memory_space<vmem>>, %arg3: memref<4x1x32xf32, #tpu.memory_space<vmem>>, %arg4: memref<96x64xf32, #tpu.memory_space<vmem>>, %arg5: memref<2x1x64xf32, #tpu.memory_space<vmem>>, %arg6: memref<8x16xf32, #tpu.memory_space<vmem>>, %arg7: memref<8x32xf32, #tpu.memory_space<vmem>>) attributes {dimension_semantics = [], scalar_prefetch = 0 : i64, scratch_operands = 0 : i64, tpu.core_type = #tpu.core_type<tc>} {
    %c0 = arith.constant 0 : index
    %c0_0 = arith.constant 0 : index
    %0 = vector.load %arg0[%c0, %c0_0] : memref<8x16xf32, #tpu.memory_space<vmem>>, vector<8x16xf32>
    %c0_1 = arith.constant 0 : index
    %c0_2 = arith.constant 0 : index
    %1 = vector.load %arg1[%c0_1, %c0_2] : memref<8x32xf32, #tpu.memory_space<vmem>>, vector<8x32xf32>
    %c0_3 = arith.constant 0 : index
    %c0_4 = arith.constant 0 : index
    %c0_5 = arith.constant 0 : index
    %2 = vector.load %arg2[%c0_3, %c0_4, %c0_5] : memref<3x48x32xf32, #tpu.memory_space<vmem>>, vector<1x16x32xf32>
    %3 = vector.shape_cast %2 : vector<1x16x32xf32> to vector<16x32xf32>
    %c0_6 = arith.constant 0 : index
    %c16 = arith.constant 16 : index
    %c0_7 = arith.constant 0 : index
    %4 = vector.load %arg2[%c0_6, %c16, %c0_7] : memref<3x48x32xf32, #tpu.memory_space<vmem>>, vector<1x32x32xf32>
    %5 = vector.shape_cast %4 : vector<1x32x32xf32> to vector<32x32xf32>
    %cst = arith.constant dense<0.000000e+00> : vector<8x32xf32>
    %6 = tpu.matmul %0, %3, %cst {dimension_numbers = #tpu.dot_dimension_numbers<[1], [0], [0], [1], [0, 0, 1, 1], [], []>} : vector<8x16xf32>, vector<16x32xf32>, vector<8x32xf32> -> vector<8x32xf32>
    %cst_8 = arith.constant dense<0.000000e+00> : vector<8x32xf32>
    %7 = tpu.matmul %1, %5, %cst_8 {dimension_numbers = #tpu.dot_dimension_numbers<[1], [0], [0], [1], [0, 0, 1, 1], [], []>} : vector<8x32xf32>, vector<32x32xf32>, vector<8x32xf32> -> vector<8x32xf32>
    %8 = arith.addf %6, %7 : vector<8x32xf32>
    %c0_9 = arith.constant 0 : index
    %c0_10 = arith.constant 0 : index
    %c0_11 = arith.constant 0 : index
    %9 = vector.load %arg3[%c0_9, %c0_10, %c0_11] : memref<4x1x32xf32, #tpu.memory_space<vmem>>, vector<1x1x32xf32>
    %10 = vector.shape_cast %9 : vector<1x1x32xf32> to vector<1x32xf32>
    %11 = vector.broadcast %10 : vector<1x32xf32> to vector<8x32xf32>
    %12 = arith.addf %8, %11 : vector<8x32xf32>
    %13 = arith.negf %12 : vector<8x32xf32>
    %14 = math.exp %13 : vector<8x32xf32>
    %cst_12 = arith.constant 1.000000e+00 : f32
    %15 = vector.broadcast %cst_12 : f32 to vector<8x32xf32>
    %16 = arith.addf %15, %14 : vector<8x32xf32>
    %17 = arith.divf %15, %16 : vector<8x32xf32>
    %c1 = arith.constant 1 : index
    %c0_13 = arith.constant 0 : index
    %c0_14 = arith.constant 0 : index
    %18 = vector.load %arg2[%c1, %c0_13, %c0_14] : memref<3x48x32xf32, #tpu.memory_space<vmem>>, vector<1x16x32xf32>
    %19 = vector.shape_cast %18 : vector<1x16x32xf32> to vector<16x32xf32>
    %c1_15 = arith.constant 1 : index
    %c16_16 = arith.constant 16 : index
    %c0_17 = arith.constant 0 : index
    %20 = vector.load %arg2[%c1_15, %c16_16, %c0_17] : memref<3x48x32xf32, #tpu.memory_space<vmem>>, vector<1x32x32xf32>
    %21 = vector.shape_cast %20 : vector<1x32x32xf32> to vector<32x32xf32>
    %cst_18 = arith.constant dense<0.000000e+00> : vector<8x32xf32>
    %22 = tpu.matmul %0, %19, %cst_18 {dimension_numbers = #tpu.dot_dimension_numbers<[1], [0], [0], [1], [0, 0, 1, 1], [], []>} : vector<8x16xf32>, vector<16x32xf32>, vector<8x32xf32> -> vector<8x32xf32>
    %cst_19 = arith.constant dense<0.000000e+00> : vector<8x32xf32>
    %23 = tpu.matmul %1, %21, %cst_19 {dimension_numbers = #tpu.dot_dimension_numbers<[1], [0], [0], [1], [0, 0, 1, 1], [], []>} : vector<8x32xf32>, vector<32x32xf32>, vector<8x32xf32> -> vector<8x32xf32>
    %24 = arith.addf %22, %23 : vector<8x32xf32>
    %c1_20 = arith.constant 1 : index
    %c0_21 = arith.constant 0 : index
    %c0_22 = arith.constant 0 : index
    %25 = vector.load %arg3[%c1_20, %c0_21, %c0_22] : memref<4x1x32xf32, #tpu.memory_space<vmem>>, vector<1x1x32xf32>
    %26 = vector.shape_cast %25 : vector<1x1x32xf32> to vector<1x32xf32>
    %27 = vector.broadcast %26 : vector<1x32xf32> to vector<8x32xf32>
    %28 = arith.addf %24, %27 : vector<8x32xf32>
    %29 = arith.negf %28 : vector<8x32xf32>
    %30 = math.exp %29 : vector<8x32xf32>
    %cst_23 = arith.constant 1.000000e+00 : f32
    %31 = vector.broadcast %cst_23 : f32 to vector<8x32xf32>
    %32 = arith.addf %31, %30 : vector<8x32xf32>
    %33 = arith.divf %31, %32 : vector<8x32xf32>
    %c2 = arith.constant 2 : index
    %c0_24 = arith.constant 0 : index
    %c0_25 = arith.constant 0 : index
    %34 = vector.load %arg2[%c2, %c0_24, %c0_25] : memref<3x48x32xf32, #tpu.memory_space<vmem>>, vector<1x16x32xf32>
    %35 = vector.shape_cast %34 : vector<1x16x32xf32> to vector<16x32xf32>
    %cst_26 = arith.constant dense<0.000000e+00> : vector<8x32xf32>
    %36 = tpu.matmul %0, %35, %cst_26 {dimension_numbers = #tpu.dot_dimension_numbers<[1], [0], [0], [1], [0, 0, 1, 1], [], []>} : vector<8x16xf32>, vector<16x32xf32>, vector<8x32xf32> -> vector<8x32xf32>
    %c2_27 = arith.constant 2 : index
    %c0_28 = arith.constant 0 : index
    %c0_29 = arith.constant 0 : index
    %37 = vector.load %arg3[%c2_27, %c0_28, %c0_29] : memref<4x1x32xf32, #tpu.memory_space<vmem>>, vector<1x1x32xf32>
    %38 = vector.shape_cast %37 : vector<1x1x32xf32> to vector<1x32xf32>
    %39 = vector.broadcast %38 : vector<1x32xf32> to vector<8x32xf32>
    %40 = arith.addf %36, %39 : vector<8x32xf32>
    %c2_30 = arith.constant 2 : index
    %c16_31 = arith.constant 16 : index
    %c0_32 = arith.constant 0 : index
    %41 = vector.load %arg2[%c2_30, %c16_31, %c0_32] : memref<3x48x32xf32, #tpu.memory_space<vmem>>, vector<1x32x32xf32>
    %42 = vector.shape_cast %41 : vector<1x32x32xf32> to vector<32x32xf32>
    %cst_33 = arith.constant dense<0.000000e+00> : vector<8x32xf32>
    %43 = tpu.matmul %1, %42, %cst_33 {dimension_numbers = #tpu.dot_dimension_numbers<[1], [0], [0], [1], [0, 0, 1, 1], [], []>} : vector<8x32xf32>, vector<32x32xf32>, vector<8x32xf32> -> vector<8x32xf32>
    %c3 = arith.constant 3 : index
    %c0_34 = arith.constant 0 : index
    %c0_35 = arith.constant 0 : index
    %44 = vector.load %arg3[%c3, %c0_34, %c0_35] : memref<4x1x32xf32, #tpu.memory_space<vmem>>, vector<1x1x32xf32>
    %45 = vector.shape_cast %44 : vector<1x1x32xf32> to vector<1x32xf32>
    %46 = vector.broadcast %45 : vector<1x32xf32> to vector<8x32xf32>
    %47 = arith.addf %43, %46 : vector<8x32xf32>
    %48 = arith.mulf %17, %47 : vector<8x32xf32>
    %49 = arith.addf %40, %48 : vector<8x32xf32>
    %50 = math.tanh %49 : vector<8x32xf32>
    %cst_36 = arith.constant 1.000000e+00 : f32
    %51 = vector.broadcast %cst_36 : f32 to vector<8x32xf32>
    %52 = arith.subf %51, %33 : vector<8x32xf32>
    %53 = arith.mulf %52, %50 : vector<8x32xf32>
    %54 = arith.mulf %33, %1 : vector<8x32xf32>
    %55 = arith.addf %53, %54 : vector<8x32xf32>
    %c0_37 = arith.constant 0 : index
    %c0_38 = arith.constant 0 : index
    %56 = vector.load %arg4[%c0_37, %c0_38] : memref<96x64xf32, #tpu.memory_space<vmem>>, vector<32x64xf32>
    %c32 = arith.constant 32 : index
    %c0_39 = arith.constant 0 : index
    %57 = vector.load %arg4[%c32, %c0_39] : memref<96x64xf32, #tpu.memory_space<vmem>>, vector<64x64xf32>
    %cst_40 = arith.constant dense<0.000000e+00> : vector<8x64xf32>
    %58 = tpu.matmul %55, %56, %cst_40 {dimension_numbers = #tpu.dot_dimension_numbers<[1], [0], [0], [1], [0, 0, 1, 1], [], []>} : vector<8x32xf32>, vector<32x64xf32>, vector<8x64xf32> -> vector<8x64xf32>
    %c0_41 = arith.constant 0 : index
    %c0_42 = arith.constant 0 : index
    %c0_43 = arith.constant 0 : index
    %59 = vector.load %arg5[%c0_41, %c0_42, %c0_43] : memref<2x1x64xf32, #tpu.memory_space<vmem>>, vector<1x1x64xf32>
    %60 = vector.shape_cast %59 : vector<1x1x64xf32> to vector<1x64xf32>
    %61 = vector.broadcast %60 : vector<1x64xf32> to vector<8x64xf32>
    %62 = arith.addf %58, %61 : vector<8x64xf32>
    %cst_44 = arith.constant 0.000000e+00 : f32
    %63 = vector.broadcast %cst_44 : f32 to vector<8x64xf32>
    %64 = arith.maximumf %62, %63 : vector<8x64xf32>
    %cst_45 = arith.constant dense<0.000000e+00> : vector<8x64xf32>
    %65 = tpu.matmul %64, %57, %cst_45 {dimension_numbers = #tpu.dot_dimension_numbers<[1], [0], [0], [1], [0, 0, 1, 1], [], []>} : vector<8x64xf32>, vector<64x64xf32>, vector<8x64xf32> -> vector<8x64xf32>
    %c1_46 = arith.constant 1 : index
    %c0_47 = arith.constant 0 : index
    %c0_48 = arith.constant 0 : index
    %66 = vector.load %arg5[%c1_46, %c0_47, %c0_48] : memref<2x1x64xf32, #tpu.memory_space<vmem>>, vector<1x1x64xf32>
    %67 = vector.shape_cast %66 : vector<1x1x64xf32> to vector<1x64xf32>
    %68 = vector.broadcast %67 : vector<1x64xf32> to vector<8x64xf32>
    %69 = arith.addf %65, %68 : vector<8x64xf32>
    %70 = vector.extract_strided_slice %69 {offsets = [0, 0], sizes = [8, 16], strides = [1, 1]} : vector<8x64xf32> to vector<8x16xf32>
    %c0_49 = arith.constant 0 : index
    %c0_50 = arith.constant 0 : index
    %71 = vector.load %arg6[%c0_49, %c0_50] : memref<8x16xf32, #tpu.memory_space<vmem>>, vector<8x16xf32>
    tpu.vector_store %arg6[%c0_49, %c0_50], %70 {strides = array<i32>} : memref<8x16xf32, #tpu.memory_space<vmem>>, vector<8x16xf32>,
    %c0_51 = arith.constant 0 : index
    %c0_52 = arith.constant 0 : index
    %72 = vector.load %arg7[%c0_51, %c0_52] : memref<8x32xf32, #tpu.memory_space<vmem>>, vector<8x32xf32>
    tpu.vector_store %arg7[%c0_51, %c0_52], %55 {strides = array<i32>} : memref<8x32xf32, #tpu.memory_space<vmem>>, vector<8x32xf32>,
    return
  }
}

</mosaic_0001>

<bundles_post_ra>
// kernel: tpu_custom_call.1
= control target key start
LH: loop header
LB: loop body
LE: loop exit
PB: predicated region body
PF: predicated region fallthrough
CT: control target
= control target key end

     0   :  { %13 = vsyncpa [#allocation3], 0  ;;  %s1273_s0 = inlined_call_operand.vmem [shape: f32[8,16], index: 0, kind: input, shape index: {}]   ;;  %s1274_s1 = inlined_call_operand.hbm [shape: f32[8,32], index: 1, kind: input, shape index: {}, may-alias: {1,7}]   ;;  %s1275_s2 = inlined_call_operand.vmem [shape: f32[3,48,32], index: 2, kind: input, shape index: {}]   ;;  %s1276_s3 = inlined_call_operand.vmem [shape: f32[4,1,32], index: 3, kind: input, shape index: {}]   ;;  %s1277_s4 = inlined_call_operand.vmem [shape: f32[96,64], index: 4, kind: input, shape index: {}]   ;;  %s1278_s5 = inlined_call_operand.vmem [shape: f32[2,1,64], index: 5, kind: input, shape index: {}]   ;;  %s1279_s6 = inlined_call_operand.hbm [shape: f32[8,16], index: 6, kind: output, shape index: {0}]   ;;  %s1280_s7 = inlined_call_operand.hbm [shape: f32[8,32], index: 7, kind: output, shape index: {1}, may-alias: {1,7}]  }
   0x1   :  { %14 = vsyncpa [#allocation4], 0 }
   0x2   :  { %15 = vsyncpa [#allocation7], 0  ;;  %s1034_s24 = smov [#allocation2]   ;;  %s962_s28 = scalar_lea.hbm %s1274_s1, 128 }
   0x3   :  { %s24_s25 = sshll.u32 %s1034_s24, 4  ;;  %p963_p0 = scmp.ne.s32.totalorder %s1274_s1, %s962_s28  ;;  %s25_s25 = int_to_ptr.vmem [resolvable:$true] %s24_s25 }
   0x4   :  { %p966_p1 = scmp.lt.u32.totalorder %s962_s28, %s1274_s1 }
   0x6   :  { %p968_p2 = pnand %p966_p1, %p963_p0 }
   0x8   :  { %971 = shalt.err (!%p968_p2)
}
   0x9   :  { %s972_s10 = scalar_lea.vmem %s25_s25, 128  ;;  %p977_p4 = scmp.lt.s32.totalorder %s25_s25, %s25_s25 }
   0xa   :  { %p973_p3 = scmp.ne.s32.totalorder %s25_s25, %s972_s10  ;;  %p978_p5 = scmp.lt.s32.totalorder %s972_s10, %s972_s10 }
   0xc   :  { %p979_p6 = por %p978_p5, %p977_p4 }
   0xe   :  { %p980_p7 = pnand %p979_p6, %p973_p3 }
  0x10   :  { %983 = shalt.err (!%p980_p7)
}
  0x11   :  { %27 = dma.hbm_to_vmem [thread:$0]  %s1274_s1, 128, %s25_s25, [#allocation3]  }
  0x12   :  { %1028 = dma.done.wait [#allocation3], 128  }
  0x13   :  { %1029 = vsyncadd [#allocation3], 4294967168  ;;  %v1035_v0 = vmov 0.0|0.0   ;;  %vm1036_vm0 = vmmov 0   ;;  %v1037_v1 = vmov 0.0   ;;  %v43_v2 = vld [vmem:[%s1275_s2 + $0x10] sm:$0xff] }
  0x14   :  { %901 = vmatprep.subr.bf16.mxu0 %v1035_v0  ;;  %825 = vmatprep.mubr.msk.f32.mxu0 %vm1036_vm0, %v1037_v1  ;;  %v44_v3 = vld [vmem:[%s1275_s2 + $0x18] sm:$0xff]  ;;  %v45_v4 = vld [vmem:[%s1275_s2 + $0x20] sm:$0xff]  ;;  %v46_v6 = vld [vmem:[%s1275_s2 + $0x28] sm:$0xff]  ;;  %vm47_vm1 = vcmask 261120   ;;  %vm121_vm2 = vcmask 130048   ;;  %vm642_vm3 = vcmask 523264  }
  0x15   :  { %910 = vmatprep.subr.bf16.mxu1 %v1035_v0  ;;  %843 = vmatprep.mubr.msk.f32.mxu1 %vm1036_vm0, %v1037_v1  ;;  %v902_v5 = vpack.c.bf16 %v44_v3, %v43_v2  ;;  %v753_v7 = vld [vmem:[%s1275_s2 + $0x40] sm:$0xff]  ;;  %v905_v8 = vpack.c.bf16 %v46_v6, %v45_v4  ;;  %v754_v9 = vld [vmem:[%s1275_s2 + $0x48] sm:$0xff]  ;;  %v755_v10 = vld [vmem:[%s1275_s2 + $0x50] sm:$0xff]  ;;  %s1038_s8 = smov [#allocation6]  }
  0x16   :  { %v756_v11 = vld [vmem:[%s1275_s2 + $0x58] sm:$0xff]  ;;  %v41_v12 = vld [vmem:[%s1275_s2] sm:$0xff]  ;;  %v42_v13 = vld [vmem:[%s1275_s2 + $0x8] sm:$0xff]  ;;  %v911_v14 = vpack.c.bf16 %v754_v9, %v753_v7  ;;  %s734_s9 = sshll.u32 %s1038_s8, 4  ;;  %s735_s9 = int_to_ptr.vmem [resolvable:$true] %s734_s9 }
  0x17   :  { %903 = vmatpush3.bf16.msra.mxu0 %v902_v5  ;;  %v914_v15 = vpack.c.bf16 %v756_v11, %v755_v10  ;;  %v1129_v16 = vld [vmem:[#allocation2] sm:$0xff]  ;;  %v908_v17 = vpack.c.bf16 %v42_v13, %v41_v12  ;;  %v767_v18 = vld [vmem:[%s1275_s2 + $0x70] sm:$0xff]  ;;  %v768_v19 = vld [vmem:[%s1275_s2 + $0x78] sm:$0xff]  ;;  %s984_s10 = scalar_lea.vmem %s735_s9, 128  ;;  %p989_p9 = scmp.lt.s32.totalorder %s735_s9, %s735_s9 }
  0x18   :  { %904 = vmatprep.subr.bf16.mxu0 %v1035_v0  ;;  %912 = vmatpush3.bf16.msra.mxu1 %v911_v14  ;;  %v751_v20 = vld [vmem:[%s1275_s2 + $0x30] sm:$0xff]  ;;  %v752_v21 = vld [vmem:[%s1275_s2 + $0x38] sm:$0xff]  ;;  %v923_v22 = vpack.c.bf16 %v768_v19, %v767_v18  ;;  %v39_v23 = vld [vmem:[%s1273_s0] sm:$0xff]  ;;  %p985_p8 = scmp.ne.s32.totalorder %s735_s9, %s984_s10  ;;  %p990_p10 = scmp.lt.s32.totalorder %s984_s10, %s984_s10 }
  0x19   :  { %913 = vmatprep.subr.bf16.mxu1 %v1035_v0  ;;  %v917_v24 = vpack.c.bf16 %v752_v21, %v751_v20  ;;  %v769_v25 = vld [vmem:[%s1275_s2 + $0x80] sm:$0xff]  ;;  %v770_v26 = vld [vmem:[%s1275_s2 + $0x88] sm:$0xff]  ;;  %v543_v33 = vld [vmem:[%s1277_s4 + $0x10] sm:$0xff] }
  0x1a   :  { %v762_v27 = vld [vmem:[%s1275_s2 + $0x60] sm:$0xff]  ;;  %v763_v28 = vld [vmem:[%s1275_s2 + $0x68] sm:$0xff]  ;;  %v926_v29 = vpack.c.bf16 %v770_v26, %v769_v25  ;;  %v544_v35 = vld [vmem:[%s1277_s4 + $0x18] sm:$0xff]  ;;  %p991_p11 = por %p990_p10, %p989_p9 }
  0x1b   :  { %906 = vmatpush3.bf16.msra.mxu0 %v905_v8  ;;  %v920_v30 = vpack.c.bf16 %v763_v28, %v762_v27  ;;  %v541_v31 = vld [vmem:[%s1277_s4] sm:$0xff]  ;;  %v542_v32 = vld [vmem:[%s1277_s4 + $0x8] sm:$0xff]  ;;  %v932_v36 = vpack.c.bf16 %v544_v35, %v543_v33  ;;  %v547_v39 = vld [vmem:[%s1277_s4 + $0x30] sm:$0xff] }
  0x1c   :  { %907 = vmatprep.subr.bf16.mxu0 %v1035_v0  ;;  %915 = vmatpush3.bf16.msra.mxu1 %v914_v15  ;;  %v929_v34 = vpack.c.bf16 %v542_v32, %v541_v31  ;;  %v545_v37 = vld [vmem:[%s1277_s4 + $0x20] sm:$0xff]  ;;  %v546_v38 = vld [vmem:[%s1277_s4 + $0x28] sm:$0xff]  ;;  %v548_v41 = vld [vmem:[%s1277_s4 + $0x38] sm:$0xff]  ;;  %p992_p12 = pnand %p991_p11, %p985_p8 }
  0x1d   :  { %922 = vmatprep.subr.bf16.mxu1 %v1035_v0  ;;  %v935_v40 = vpack.c.bf16 %v546_v38, %v545_v37  ;;  %v938_v42 = vpack.c.bf16 %v548_v41, %v547_v39  ;;  %v549_v43 = vld [vmem:[%s1277_s4 + $0x40] sm:$0xff]  ;;  %v550_v44 = vld [vmem:[%s1277_s4 + $0x48] sm:$0xff]  ;;  %v551_v20 = vld [vmem:[%s1277_s4 + $0x50] sm:$0xff] }
  0x1e   :  { %826 = vmatmul.mubr.msk.f32.vlgmr.msra.gmra.mrb[0].mxu0 %vm47_vm1, %v1129_v16  ;;  %v941_v45 = vpack.c.bf16 %v550_v44, %v549_v43  ;;  %v749_v50 = vld [vmem:[%s1276_s3] ss:$0 sm:$0xff]  ;;  %v760_v56 = vld [vmem:[%s1276_s3 + $0x1] ss:$0 sm:$0xff]  ;;  %v772_v5 = vld [vmem:[%s1276_s3 + $0x3] ss:$0 sm:$0xff] }
  0x1f   :  { %909 = vmatpush3.bf16.msra.mxu0 %v908_v17  ;;  %832 = vmatprep.mubr.msk.f32.mxu0 %vm1036_vm0, %v1037_v1  ;;  %v765_v7 = vld [vmem:[%s1276_s3 + $0x2] ss:$0 sm:$0xff]  ;;  %v552_v21 = vld [vmem:[%s1277_s4 + $0x58] sm:$0xff] }
  0x20   :  { %916 = vmatprep.subr.bf16.mxu0 %v1035_v0  ;;  %844 = vmatmul.mubr.msk.f32.vlgmr.msra.gmra.mrb[0].mxu1 %vm47_vm1, %v1129_v16 }
  0x21   :  { %924 = vmatpush3.bf16.msra.mxu1 %v923_v22  ;;  %868 = vmatprep.mubr.msk.f32.mxu1 %vm1036_vm0, %v1037_v1  ;;  %v944_v22 = vpack.c.bf16 %v552_v21, %v551_v20 }
  0x22   :  { %833 = vmatmul.mubr.msk.f32.vlgmr.msra.gmra.mrb[2].mxu0 %vm121_vm2, %v39_v23  ;;  %925 = vmatprep.subr.bf16.mxu1 %v1035_v0 }
  0x23   :  { %918 = vmatpush3.bf16.msra.mxu0 %v917_v24  ;;  %850 = vmatprep.mubr.msk.f32.mxu0 %vm1036_vm0, %v1037_v1 }
  0x24   :  { %919 = vmatprep.subr.bf16.mxu0 %v1035_v0 }
  0x25   :  { %927 = vmatpush3.bf16.msra.mxu1 %v926_v29 }
  0x26   :  { %851 = vmatmul.mubr.msk.f32.vlgmr.msra.gmra.mrb[4].mxu0 %vm121_vm2, %v39_v23  ;;  %934 = vmatprep.subr.bf16.mxu1 %v1035_v0 }
  0x27   :  { %921 = vmatpush3.bf16.msra.mxu0 %v920_v30  ;;  %857 = vmatprep.mubr.msk.f32.mxu0 %vm1036_vm0, %v1037_v1 }
  0x28   :  { %928 = vmatprep.subr.bf16.mxu0 %v1035_v0  ;;  %869 = vmatmul.mubr.msk.f32.vlgmr.msra.gmra.mrb[2].mxu1 %vm47_vm1, %v1129_v16 }
  0x29   :  { %898 = vmatprep.mubr.msk.f32.mxu1 %vm1036_vm0, %v1037_v1  ;;  %936 = vmatpush3.bf16.msra.mxu1 %v935_v40 }
  0x2a   :  { %858 = vmatmul.mubr.msk.f32.vlgmr.msra.gmra.mrb[6].mxu0 %vm121_vm2, %v39_v23  ;;  %937 = vmatprep.subr.bf16.mxu1 %v1035_v0  ;;  %v774_v23 = vld [vmem:[%s1278_s5] ss:$0 sm:$0xff] }
  0x2b   :  { %879 = vmatprep.mubr.msk.f32.mxu0 %vm1036_vm0, %v1037_v1  ;;  %930 = vmatpush3.bf16.msra.mxu0 %v929_v34 }
  0x2c   :  { %931 = vmatprep.subr.bf16.mxu0 %v1035_v0 }
  0x2d   :  { %939 = vmatpush3.bf16.msra.mxu1 %v938_v42 }
  0x2e   :  { %940 = vmatprep.subr.bf16.mxu1 %v1035_v0 }
  0x2f   :  { %933 = vmatpush3.bf16.msra.mxu0 %v932_v36 }
  0x31   :  { %942 = vmatpush3.bf16.msra.mxu1 %v941_v45 }
  0x32   :  { %943 = vmatprep.subr.bf16.mxu1 %v1035_v0 }
  0x35   :  { %945 = vmatpush3.bf16.msra.mxu1 %v944_v22 }
  0xf1   :  { %v117_v46 = vpop.f32.mrb[0].mxu0 }
  0xf2   :  { %v827_v47 = vpop.f32.mrb[1].mxu0 }
  0xf3   :  { %v282_v48 = vpop.f32.mrb[0].mxu1 }
  0xf4   :  { %v845_v51 = vpop.f32.mrb[1].mxu1 }
  0xf5   :  { %v191_v49 = vpop.f32.mrb[2].mxu0 }
  0xf6   :  { %v192_v52 = vadd.f32 %v191_v49, %v117_v46  ;;  %v834_v53 = vpop.f32.mrb[3].mxu0 }
  0xf8   :  { %v202_v54 = vadd.f32 %v749_v50, %v192_v52 }
  0xf9   :  { %v352_v55 = vpop.f32.mrb[4].mxu0 }
  0xfa   :  { %v750_v57 = vmul.f32 -1.442695, %v202_v54  ;;  %v353_v58 = vadd.f32 %v352_v55, %v282_v48  ;;  %v852_v59 = vpop.f32.mrb[5].mxu0 }
  0xfb   :  { %v530_v61 = vpop.f32.mrb[2].mxu1 }
  0xfc   :  { %952 = vpow2.f32 %v750_v57  ;;  %v364_v60 = vadd.f32 %v760_v56, %v353_v58  ;;  %v870_v62 = vpop.f32.mrb[3].mxu1  ;;  %v531_v8 = vadd.f32 %v772_v5, %v530_v61 }
  0xfd   :  { %v448_v63 = vpop.f32.mrb[6].mxu0 }
  0xfe   :  { %v761_v0 = vmul.f32 -1.442695, %v364_v60  ;;  %v859_v1 = vpop.f32.mrb[7].mxu0  ;;  %v449_v9 = vadd.f32 %v765_v7, %v448_v63 }
 0x100   :  { %954 = vpow2.f32 %v761_v0 }
 0x106   :  { %v953_v2 = vpop.eup %952 }
 0x107   :  { %v206_v3 = vadd.f32 1.0, %v953_v2 }
 0x109   :  { %956 = vrcp.f32 %v206_v3 }
 0x10a   :  { %v955_v4 = vpop.eup %954 }
 0x10b   :  { %v368_v6 = vadd.f32 1.0, %v955_v4 }
 0x10d   :  { %958 = vrcp.f32 %v368_v6 }
 0x113   :  { %v957_v10 = vpop.eup %956 }
 0x114   :  { %v534_v11 = vmul.f32 %v957_v10, %v531_v8 }
 0x116   :  { %v535_v12 = vadd.f32 %v534_v11, %v449_v9 }
 0x117   :  { %v959_v13 = vpop.eup %958 }
 0x118   :  { %960 = vtanh.f32 %v535_v12  ;;  %v537_v14 = vsub.f32 1.0, %v959_v13  ;;  %v539_v18 = vmul.f32 %v959_v13, %v1129_v16 }
 0x122   :  { %v961_v15 = vpop.eup %960 }
 0x123   :  { %v538_v17 = vmul.f32 %v961_v15, %v537_v14 }
 0x125   :  { %v540_v19 = vadd.f32 %v539_v18, %v538_v17 }
 0x127   :  { %880 = vmatmul.mubr.msk.f32.vlgmr.msra.gmra.mrb[8].mxu0 %vm47_vm1, %v540_v19  ;;  %717 = vst.msk [vmem:[#allocation6] sm:$0xff] %vm47_vm1, %v540_v19 }
 0x1fa   :  { %v629_v16 = vpop.f32.mrb[8].mxu0 }
 0x1fb   :  { %v630_v24 = vadd.f32 %v774_v23, %v629_v16  ;;  %v881_v25 = vpop.f32.mrb[9].mxu0 }
 0x1fd   :  { %v633_v26 = vmax.f32 %v630_v24, 0.0 }
 0x1ff   :  { %899 = vmatmul.mubr.msk.f32.vlgmr.msra.gmra.mrb[4].mxu1 %vm642_vm3, %v633_v26 }
 0x200   :  { %995 = shalt.err (!%p992_p12)
}
 0x201   :  { %s996_s12 = scalar_lea.hbm %s1280_s7, 128 }
 0x202   :  { %p997_p13 = scmp.ne.s32.totalorder %s1280_s7, %s996_s12  ;;  %p1000_p0 = scmp.lt.u32.totalorder %s996_s12, %s1280_s7 }
 0x204   :  { %p1002_p1 = pnand %p1000_p0, %p997_p13 }
 0x206   :  { %1005 = shalt.err (!%p1002_p1)
}
 0x207   :  { %737 = dma.vmem_to_hbm [thread:$0]  %s735_s9, 128, %s1280_s7, [#allocation7]   ;;  %v777_v27 = vld [vmem:[%s1278_s5 + $0x1] ss:$0 sm:$0xff] }
 0x208   :  { %s1039_s20 = smov [#allocation5]  }
 0x209   :  { %s724_s21 = sshll.u32 %s1039_s20, 4  ;;  %s725_s21 = int_to_ptr.vmem [resolvable:$true] %s724_s21 }
 0x20a   :  { %s1006_s22 = scalar_lea.vmem %s725_s21, 128  ;;  %p1011_p3 = scmp.lt.s32.totalorder %s725_s21, %s725_s21 }
 0x20b   :  { %p1007_p2 = scmp.ne.s32.totalorder %s725_s21, %s1006_s22  ;;  %p1012_p4 = scmp.lt.s32.totalorder %s1006_s22, %s1006_s22 }
 0x20d   :  { %p1013_p5 = por %p1012_p4, %p1011_p3 }
 0x20f   :  { %p1014_p6 = pnand %p1013_p5, %p1007_p2 }
 0x2d2   :  { %v712_v28 = vpop.f32.mrb[4].mxu1 }
 0x2d3   :  { %v713_v29 = vadd.f32 %v777_v27, %v712_v28  ;;  %v900_v30 = vpop.f32.mrb[5].mxu1 }
 0x2d5   :  { %716 = vst.msk [vmem:[#allocation5] sm:$0xff] %vm121_vm2, %v713_v29 }
 0x2d6   :  { %1017 = shalt.err (!%p1014_p6)
}
 0x2d7   :  { %s1018_s24 = scalar_lea.hbm %s1279_s6, 128 }
 0x2d8   :  { %p1019_p7 = scmp.ne.s32.totalorder %s1279_s6, %s1018_s24  ;;  %p1022_p8 = scmp.lt.u32.totalorder %s1018_s24, %s1279_s6 }
 0x2da   :  { %p1024_p9 = pnand %p1022_p8, %p1019_p7 }
 0x2dc   :  { %1027 = shalt.err (!%p1024_p9)
}
 0x2dd   :  { %727 = dma.vmem_to_hbm [thread:$0]  %s725_s21, 128, %s1279_s6, [#allocation4]  }
 0x2de   :  { %1030 = dma.done.wait [#allocation4], 128  }
 0x2df   :  { %1031 = vsyncadd [#allocation4], 4294967168 }
 0x2e0   :  { %1032 = dma.done.wait [#allocation7], 128  }
 0x2e1   :  { %1033 = vsyncadd [#allocation7], 4294967168 }
 0x2e2   :  { %744 = vsyncpa [#allocation3], 1 }
 0x2e3   :  { %745 = vsyncpa [#allocation4], 1 }
 0x2e4   :  { %746 = vsyncpa [#allocation7], 1 }

</bundles_post_ra>
